<compile_context>
chip_gen: v6e
topology: v6e:2x2x1
jax: 0.10.0
libtpu: 0.0.40
codegen_flags: <defaults>
</compile_context>

<pallas_src>
import jax
import jax.numpy as jnp
from jax.experimental import pallas as pl
from jax.experimental.pallas import tpu as pltpu


def _additive_attention_kernel(x_ref, w12_ref, b12_ref, v_ref, o_ref):
    x = x_ref[...]                                    # (TB, T, D)
    TB, T, D = x.shape
    w12 = w12_ref[...]                                # (D, D), MXU dtype

    # Folded (W1 + W2) linear: one (TB*T, D) x (D, D) MXU matmul, f32 accumulate.
    # The leading-dim merge/split reshapes are layout-free when T is a multiple
    # of the sublane tile (8 for f32 x, 16 for bf16 x); pad T upstream otherwise.
    x2 = x.reshape(TB * T, D).astype(w12.dtype)
    h = jnp.dot(x2, w12, preferred_element_type=jnp.float32) + b12_ref[...]
    s = jnp.tanh(h).reshape(TB, T, D)                 # (TB, T, D), f32

    # Attention scores, lane-dense (TB, T): VPU multiply + lane (XLU) reduce
    # (avoids an N=1 MXU matmul and width-1-lane intermediates).
    scores = jnp.sum(s * v_ref[...], axis=-1)         # (TB, T)

    # Softmax over T (PyTorch dim=1); T is the last (lane) axis here.
    m = jnp.max(scores, axis=-1, keepdims=True)       # (TB, 1)
    e = jnp.exp(scores - m)                           # (TB, T)
    inv = pl.reciprocal(jnp.sum(e, axis=-1, keepdims=True), approx=True)  # EUP
    attn = e * inv                                    # (TB, T), rows sum to ~1

    # Weighted sum over T -> (TB, D), all f32.
    xf = x.astype(jnp.float32)
    if T >= 128:
        # Large T: contract on the MXU (frees the VPU/XLU sublane-reduce slots).
        out = jnp.einsum("bqt,btd->bqd", attn[:, None, :], xf,
                         preferred_element_type=jnp.float32)[:, 0, :]
    else:
        # Small T: VPU broadcast-mul + sublane reduce.
        out = jnp.sum(xf * attn[:, :, None], axis=1)
    o_ref[...] = out.astype(o_ref.dtype)


def _tpu_vmem_and_cores():
    """(per-core VMEM capacity in bytes, TensorCores per chip) of the local TPU."""
    try:
        kind = jax.devices()[0].device_kind.lower()
    except Exception:
        kind = ""
    if "v7" in kind:
        vmem, cores = 64 * 1024 * 1024, 2      # v7x: 64 MiB / TC, 2 TCs per chip
    elif "v5" in kind or "v6" in kind:
        vmem, cores = 128 * 1024 * 1024, 1     # v5e / v6e: 128 MiB, 1 TC
    else:
        vmem, cores = 64 * 1024 * 1024, 1      # conservative default
    try:  # prefer the exact number when the API is available
        vmem = int(pltpu.get_tpu_info().vmem_capacity_bytes)
    except Exception:
        pass
    return vmem, cores


def _pick_block_b(B, T, D, *, x_itemsize, w_itemsize, out_itemsize,
                  vmem_budget, n_cores=1):
    """Largest divisor of B whose per-step working set fits the VMEM budget."""
    fixed = D * D * w_itemsize + 2 * D * 4            # single-buffered weights

    def fits(tb):
        per_step = (2 * tb * T * D * x_itemsize       # x tile (double-buffered)
                    + 2 * tb * D * out_itemsize       # out tile (double-buffered)
                    + tb * T * D * 4)                  # f32 tanh intermediate
        return fixed + per_step <= vmem_budget

    best = 1
    for cand in range(1, B + 1):
        if B % cand == 0 and fits(cand):
            best = cand
    # Only multi-TC parts (v7x) need >= n_cores grid steps so that
    # dimension_semantics=("parallel",) can shard the grid across cores.
    if n_cores > 1 and B // best < n_cores:
        for cand in range(best, 0, -1):
            if B % cand == 0 and B // cand >= n_cores:
                best = cand
                break
    return best


def _resident_spec(block_shape, index_map):
    """BlockSpec for a grid-invariant operand; single-buffered when supported."""
    if hasattr(pl, "Buffered"):
        try:
            return pl.BlockSpec(block_shape, index_map,
                                pipeline_mode=pl.Buffered(buffer_count=1))
        except TypeError:
            pass
    return pl.BlockSpec(block_shape, index_map)


def additive_attention(x, w1_t, b1, w2_t, b2, v_t, *, block_b=None,
                       mxu_dtype=jnp.bfloat16, vmem_limit_bytes=None):
    """x: (B, T, D); w1_t/w2_t: (D, D) == Linear.weight.T; b1/b2: (D,) or (1, D);
    v_t: (D, 1) or (D,) == V.weight.T.  Returns (B, D).

    mxu_dtype controls only the matmul operand dtype (f32 accumulate); pass
    None for exact-f32 MXU operands."""
    B, T, D = x.shape

    # Fold the two Linear layers: x@W1^T + b1 + x@W2^T + b2 == x@(W1^T+W2^T) + (b1+b2).
    w12 = w1_t + w2_t                                               # (D, D)
    if mxu_dtype is not None:
        w12 = w12.astype(mxu_dtype)
    b12 = (jnp.reshape(b1, (1, D)) + jnp.reshape(b2, (1, D))).astype(jnp.float32)
    v_row = jnp.reshape(v_t, (1, D)).astype(jnp.float32)            # V^T lane row

    x_itemsize = jnp.dtype(x.dtype).itemsize
    w_itemsize = jnp.dtype(w12.dtype).itemsize
    vmem_cap, n_cores = _tpu_vmem_and_cores()

    if block_b is None:
        block_b = _pick_block_b(
            B, T, D,
            x_itemsize=x_itemsize, w_itemsize=w_itemsize, out_itemsize=x_itemsize,
            vmem_budget=vmem_cap // 2, n_cores=n_cores)
    if B % block_b != 0:
        # cdiv padding would feed garbage rows to the softmax (possible inf/NaN
        # in discarded OOB output rows); require an exact tiling instead.
        raise ValueError(f"block_b={block_b} must divide B={B}")
    grid = (B // block_b,)

    if vmem_limit_bytes is None:
        vmem_limit_bytes = int(vmem_cap * 3 // 4)

    cost = pl.CostEstimate(
        flops=2 * B * T * D * D + 4 * B * T * D,
        transcendentals=B * T * D + 2 * B * T,
        bytes_accessed=B * T * D * x_itemsize + D * D * w_itemsize
                       + 2 * D * 4 + B * D * x_itemsize,
    )

    return pl.pallas_call(
        _additive_attention_kernel,
        out_shape=jax.ShapeDtypeStruct((B, D), x.dtype),
        grid=grid,
        in_specs=[
            pl.BlockSpec((block_b, T, D), lambda b: (b, 0, 0)),   # x batch tile
            _resident_spec((D, D), lambda b: (0, 0)),             # folded weight
            _resident_spec((1, D), lambda b: (0, 0)),             # folded bias
            _resident_spec((1, D), lambda b: (0, 0)),             # V^T row
        ],
        out_specs=pl.BlockSpec((block_b, D), lambda b: (b, 0)),
        compiler_params=pltpu.CompilerParams(
            dimension_semantics=("parallel",),
            vmem_limit_bytes=vmem_limit_bytes),
        cost_estimate=cost,
    )(x, w12, b12, v_row)


def additive_attention_ref(x, w1_t, b1, w2_t, b2, v_t):
    # Pure-JAX reference mirroring the PyTorch forward.
    h1 = x @ w1_t + jnp.reshape(b1, (1, 1, -1))
    h2 = x @ w2_t + jnp.reshape(b2, (1, 1, -1))
    s = jnp.tanh(h1 + h2)
    w = s @ jnp.reshape(v_t, (-1, 1))               # (B, T, 1)
    attn = jax.nn.softmax(w, axis=1)
    return jnp.sum(x * attn, axis=1)                # (B, D)


if __name__ == "__main__":
    B, T, D = 2, 8, 32  # x: (batch, T, seq_len); D == seq_len == Linear feature dim

    key = jax.random.PRNGKey(0)
    kx, k1, k2, k3, k4, k5 = jax.random.split(key, 6)

    x = jax.random.normal(kx, (B, T, D), dtype=jnp.float32)

    # Deterministic params (shapes match nn.Linear(seq_len, seq_len), nn.Linear(seq_len, 1)).
    scale = 1.0 / jnp.sqrt(jnp.float32(D))
    w1_t = jax.random.uniform(k1, (D, D), jnp.float32, -scale, scale)   # W1.weight.T
    b1 = jax.random.uniform(k2, (D,), jnp.float32, -scale, scale)       # W1.bias
    w2_t = jax.random.uniform(k3, (D, D), jnp.float32, -scale, scale)   # W2.weight.T
    b2 = jax.random.uniform(k4, (D,), jnp.float32, -scale, scale)       # W2.bias
    v_t = jax.random.uniform(k5, (D, 1), jnp.float32, -scale, scale)    # V.weight.T

    ref = additive_attention_ref(x, w1_t, b1, w2_t, b2, v_t)

    # Exact-f32 MXU path: only deviation from the reference is the EUP
    # approximate reciprocal used for the softmax normalization.
    out_f32 = jax.block_until_ready(
        additive_attention(x, w1_t, b1, w2_t, b2, v_t, mxu_dtype=None))
    assert out_f32.shape == (B, D)
    assert jnp.allclose(out_f32, ref, atol=2e-3, rtol=2e-3), "f32 path mismatch"

    # Default path: bf16 MXU operands (f32 accumulate / f32 elementwise math),
    # so a looser tolerance vs. the pure-f32 reference is expected.
    out_bf16 = jax.block_until_ready(
        additive_attention(x, w1_t, b1, w2_t, b2, v_t))
    assert out_bf16.shape == (B, D)
    assert jnp.allclose(out_bf16, ref, atol=5e-2, rtol=5e-2), "bf16 path mismatch"

    print("KERNEL_OK")
</pallas_src>

<mosaic_0001>
module attributes {stable_mosaic.version = 11 : i64} {
  func.func @_additive_attention_kernel(%arg0: i32, %arg1: memref<2x8x32xf32, #tpu.memory_space<vmem>>, %arg2: memref<32x32xf32, #tpu.memory_space<vmem>>, %arg3: memref<1x32xf32, #tpu.memory_space<vmem>>, %arg4: memref<1x32xf32, #tpu.memory_space<vmem>>, %arg5: memref<2x32xf32, #tpu.memory_space<vmem>>) attributes {dimension_semantics = [#tpu.dimension_semantics<parallel>], iteration_bounds = array<i64: 1>, scalar_prefetch = 0 : i64, scratch_operands = 0 : i64, tpu.core_type = #tpu.core_type<tc>, window_params = [{transform_indices = @transform_0, window_bounds = array<i64: 2, 8, 32>}, {pipeline_mode = #tpu.pipeline_mode<synchronous>, transform_indices = @transform_1, window_bounds = array<i64: 32, 32>}, {pipeline_mode = #tpu.pipeline_mode<synchronous>, transform_indices = @transform_2, window_bounds = array<i64: 1, 32>}, {pipeline_mode = #tpu.pipeline_mode<synchronous>, transform_indices = @transform_3, window_bounds = array<i64: 1, 32>}, {transform_indices = @transform_4, window_bounds = array<i64: 2, 32>}]} {
    %c0 = arith.constant 0 : index
    %c0_0 = arith.constant 0 : index
    %c0_1 = arith.constant 0 : index
    %0 = vector.load %arg1[%c0, %c0_0, %c0_1] : memref<2x8x32xf32, #tpu.memory_space<vmem>>, vector<2x8x32xf32>
    %c0_2 = arith.constant 0 : index
    %c0_3 = arith.constant 0 : index
    %1 = vector.load %arg2[%c0_2, %c0_3] : memref<32x32xf32, #tpu.memory_space<vmem>>, vector<32x32xf32>
    %2 = vector.shape_cast %0 : vector<2x8x32xf32> to vector<16x32xf32>
    %cst = arith.constant dense<0.000000e+00> : vector<16x32xf32>
    %3 = tpu.matmul %2, %1, %cst {dimension_numbers = #tpu.dot_dimension_numbers<[1], [0], [0], [1], [0, 0, 1, 1], [], []>} : vector<16x32xf32>, vector<32x32xf32>, vector<16x32xf32> -> vector<16x32xf32>
    %c0_4 = arith.constant 0 : index
    %c0_5 = arith.constant 0 : index
    %4 = vector.load %arg3[%c0_4, %c0_5] : memref<1x32xf32, #tpu.memory_space<vmem>>, vector<1x32xf32>
    %5 = vector.broadcast %4 : vector<1x32xf32> to vector<16x32xf32>
    %6 = arith.addf %3, %5 : vector<16x32xf32>
    %7 = math.tanh %6 : vector<16x32xf32>
    %8 = vector.shape_cast %7 : vector<16x32xf32> to vector<2x8x32xf32>
    %c0_6 = arith.constant 0 : index
    %c0_7 = arith.constant 0 : index
    %9 = vector.load %arg4[%c0_6, %c0_7] : memref<1x32xf32, #tpu.memory_space<vmem>>, vector<1x32xf32>
    %10 = vector.shape_cast %9 : vector<1x32xf32> to vector<1x1x32xf32>
    %11 = vector.broadcast %10 : vector<1x1x32xf32> to vector<2x8x32xf32>
    %12 = arith.mulf %8, %11 : vector<2x8x32xf32>
    %cst_8 = arith.constant dense<0.000000e+00> : vector<2x8xf32>
    %13 = vector.multi_reduction <add>, %12, %cst_8 [2] : vector<2x8x32xf32> to vector<2x8xf32>
    %cst_9 = arith.constant dense<0xFF800000> : vector<2xf32>
    %14 = vector.multi_reduction <maximumf>, %13, %cst_9 [1] : vector<2x8xf32> to vector<2xf32>
    %15 = vector.shape_cast %14 : vector<2xf32> to vector<2x1xf32>
    %16 = vector.broadcast %15 : vector<2x1xf32> to vector<2x8xf32>
    %17 = arith.subf %13, %16 : vector<2x8xf32>
    %18 = math.exp %17 : vector<2x8xf32>
    %cst_10 = arith.constant dense<0.000000e+00> : vector<2xf32>
    %19 = vector.multi_reduction <add>, %18, %cst_10 [1] : vector<2x8xf32> to vector<2xf32>
    %20 = vector.shape_cast %19 : vector<2xf32> to vector<2x1xf32>
    %21 = tpu.reciprocal %20 {approx = true} : vector<2x1xf32> -> vector<2x1xf32>
    %22 = vector.broadcast %21 : vector<2x1xf32> to vector<2x8xf32>
    %23 = arith.mulf %18, %22 : vector<2x8xf32>
    %24 = vector.shape_cast %23 : vector<2x8xf32> to vector<2x8x1xf32>
    %25 = vector.broadcast %24 : vector<2x8x1xf32> to vector<2x8x32xf32>
    %26 = arith.mulf %0, %25 : vector<2x8x32xf32>
    %cst_11 = arith.constant dense<0.000000e+00> : vector<2x32xf32>
    %27 = vector.multi_reduction <add>, %26, %cst_11 [1] : vector<2x8x32xf32> to vector<2x32xf32>
    %c0_12 = arith.constant 0 : index
    %c0_13 = arith.constant 0 : index
    %28 = vector.load %arg5[%c0_12, %c0_13] : memref<2x32xf32, #tpu.memory_space<vmem>>, vector<2x32xf32>
    tpu.vector_store %arg5[%c0_12, %c0_13], %27 {strides = array<i32>} : memref<2x32xf32, #tpu.memory_space<vmem>>, vector<2x32xf32>,
    return
  }
  func.func @transform_0(%arg0: i32) -> (i32, i32, i32) {
    %c0_i32 = arith.constant 0 : i32
    %c0_i32_0 = arith.constant 0 : i32
    %c0_i32_1 = arith.constant 0 : i32
    return %arg0, %c0_i32, %c0_i32_0 : i32, i32, i32
  }
  func.func @transform_1(%arg0: i32) -> (i32, i32) {
    %c0_i32 = arith.constant 0 : i32
    %c0_i32_0 = arith.constant 0 : i32
    %c0_i32_1 = arith.constant 0 : i32
    return %c0_i32, %c0_i32_0 : i32, i32
  }
  func.func @transform_2(%arg0: i32) -> (i32, i32) {
    %c0_i32 = arith.constant 0 : i32
    %c0_i32_0 = arith.constant 0 : i32
    %c0_i32_1 = arith.constant 0 : i32
    return %c0_i32, %c0_i32_0 : i32, i32
  }
  func.func @transform_3(%arg0: i32) -> (i32, i32) {
    %c0_i32 = arith.constant 0 : i32
    %c0_i32_0 = arith.constant 0 : i32
    %c0_i32_1 = arith.constant 0 : i32
    return %c0_i32, %c0_i32_0 : i32, i32
  }
  func.func @transform_4(%arg0: i32) -> (i32, i32) {
    %c0_i32 = arith.constant 0 : i32
    %c0_i32_0 = arith.constant 0 : i32
    return %arg0, %c0_i32 : i32, i32
  }
}

</mosaic_0001>

<bundles_post_ra>
// kernel: tpu_custom_call.1
= control target key start
LH: loop header
LB: loop body
LE: loop exit
PB: predicated region body
PF: predicated region fallthrough
CT: control target
= control target key end

     0   :  { %9 = vsyncpa [#allocation3], 0  ;;  %s447_s0 = inlined_call_operand.hbm [shape: f32[2,8,32], index: 0, kind: input, shape index: {}]   ;;  %s448_s1 = inlined_call_operand.hbm [shape: f32[32,32], index: 1, kind: input, shape index: {}]   ;;  %s449_s2 = inlined_call_operand.vmem [shape: f32[1,32], index: 2, kind: input, shape index: {}]   ;;  %s450_s3 = inlined_call_operand.vmem [shape: f32[1,32], index: 3, kind: input, shape index: {}]   ;;  %s451_s4 = inlined_call_operand.hbm [shape: f32[2,32], index: 4, kind: output, shape index: {}]  }
   0x1   :  { %10 = vsyncpa [#allocation6], 0 }
   0x2   :  { %11 = vsyncpa [#allocation4], 0  ;;  %s382_s15 = smov [#allocation2]  }
   0x3   :  { %s17_s16 = sshll.u32 %s382_s15, 4  ;;  %s18_s16 = int_to_ptr.vmem [resolvable:$true] %s17_s16 }
   0x4   :  { %s324_s17 = scalar_lea.vmem %s18_s16, 256  ;;  %p329_p1 = scmp.lt.s32.totalorder %s18_s16, %s18_s16 }
   0x5   :  { %p325_p0 = scmp.ne.s32.totalorder %s18_s16, %s324_s17  ;;  %p330_p2 = scmp.lt.s32.totalorder %s324_s17, %s324_s17 }
   0x7   :  { %p331_p3 = por %p330_p2, %p329_p1 }
   0x9   :  { %p332_p4 = pnand %p331_p3, %p325_p0 }
   0xb   :  { %335 = shalt.err (!%p332_p4)
}
   0xc   :  { %s383_s18 = smov 128   ;;  %s384_s19 = smov 8  }
   0xd   :  { %23 = dma.hbm_to_vmem [thread:$0]  %s447_s0, 256, %s18_s16, [#allocation3], %s383_s18, %s383_s18, %s384_s19  }
   0xe   :  { %s385_s22 = smov [#allocation5]  }
   0xf   :  { %s29_s23 = sshll.u32 %s385_s22, 4  ;;  %s30_s23 = int_to_ptr.vmem [resolvable:$true] %s29_s23 }
  0x10   :  { %s344_s24 = scalar_lea.vmem %s30_s23, 512  ;;  %p349_p6 = scmp.lt.s32.totalorder %s30_s23, %s30_s23 }
  0x11   :  { %p345_p5 = scmp.ne.s32.totalorder %s30_s23, %s344_s24  ;;  %p350_p7 = scmp.lt.s32.totalorder %s344_s24, %s344_s24 }
  0x13   :  { %p351_p8 = por %p350_p7, %p349_p6 }
  0x15   :  { %p352_p9 = pnand %p351_p8, %p345_p5 }
  0x17   :  { %355 = shalt.err (!%p352_p9)
}
  0x18   :  { %35 = dma.hbm_to_vmem [thread:$0]  %s448_s1, 512, %s30_s23, [#allocation6], %s383_s18, %s383_s18, %s384_s19  }
  0x19   :  { %376 = dma.done.wait [#allocation3], 256  }
  0x1a   :  { %377 = vsyncadd [#allocation3], 4294967040 }
  0x1b   :  { %378 = dma.done.wait [#allocation6], 512  }
  0x1c   :  { %379 = vsyncadd [#allocation6], 4294966784  ;;  %vm59_vm0 = vcmask 261120   ;;  %v51_v0 = vld [vmem:[#allocation5 + $0x18] sm:$0xff]  ;;  %v50_v1 = vld [vmem:[#allocation5 + $0x10] sm:$0xff]  ;;  %v160_v18 = vlaneseq  ;;  %vm170_vm1 = vcmask 1041409  }
  0x1d   :  { %287 = vmatprep.subr.mxu0 %v51_v0  ;;  %v419_v2 = vld [vmem:[#allocation2] sm:$0xff]  ;;  %v49_v3 = vld [vmem:[#allocation5 + $0x8] sm:$0xff]  ;;  %v48_v4 = vld [vmem:[#allocation5] sm:$0xff]  ;;  %vm173_vm2 = vcmask 58368   ;;  %v386_v28 = vmov 0   ;;  %vm259_vm3 = vcmask 254976  }
  0x1e   :  { %288 = vmatpush3.msra.mxu0 %v51_v0  ;;  %295 = vmatprep.mubr.msk.f32.mxu0 %vm59_vm0, %v419_v2  ;;  %v423_v5 = vld [vmem:[#allocation2 + $0x8] sm:$0xff]  ;;  %v277_v6 = vld [vmem:[%s449_s2] ss:$0 sm:$0xff]  ;;  %v161_v19 = vand.u32 127, %v160_v18  ;;  %v163_v20 = vshrl.u32 %v160_v18, 7  ;;  %s387_s2 = smov [#allocation7]  }
  0x1f   :  { %289 = vmatprep.subr.mxu0 %v50_v1  ;;  %v280_v13 = vld [vmem:[%s450_s3] ss:$0 sm:$0xff]  ;;  %305 = vset.pattern.permute.xlu0 %v386_v28  ;;  %s267_s3 = sshll.u32 %s387_s2, 4  ;;  %s268_s3 = int_to_ptr.vmem [resolvable:$true] %s267_s3 }
  0x20   :  { %290 = vmatpush3.msra.mxu0 %v50_v1  ;;  %v164_v22 = vsub.s32 %v161_v19, %v163_v20  ;;  %304 = vset.pattern.permute.xlu1 %v386_v28  ;;  %v180_v29 = vsub.s32 0, %v163_v20  ;;  %v184_v30 = vsub.s32 1, %v163_v20  ;;  %s356_s29 = scalar_lea.vmem %s268_s3, 32  ;;  %p361_p11 = scmp.lt.s32.totalorder %s268_s3, %s268_s3 }
  0x21   :  { %291 = vmatprep.subr.mxu0 %v49_v3  ;;  %p357_p10 = scmp.ne.s32.totalorder %s268_s3, %s356_s29  ;;  %p362_p12 = scmp.lt.s32.totalorder %s356_s29, %s356_s29 }
  0x22   :  { %292 = vmatpush3.msra.mxu0 %v49_v3 }
  0x23   :  { %293 = vmatprep.subr.mxu0 %v48_v4  ;;  %p363_p13 = por %p362_p12, %p361_p11 }
  0x24   :  { %294 = vmatpush3.msra.mxu0 %v48_v4 }
  0x25   :  { %296 = vmatmul.mubr.msk.f32.vlgmr.msra.gmra.mxu0 %vm59_vm0, %v423_v5  ;;  %p364_p0 = pnand %p363_p13, %p357_p10 }
  0xe5   :  { %v297_v7 = vpop.f32.mrf.mxu0 }
  0xe6   :  { %v138_v8 = vadd.f32 %v297_v7, %v277_v6 }
  0xe7   :  { %v132_v9 = vpop.f32.mrf.mxu0 }
  0xe8   :  { %v133_v10 = vadd.f32 %v277_v6, %v132_v9  ;;  %306 = vtanh.f32 %v138_v8 }
  0xea   :  { %308 = vtanh.f32 %v133_v10 }
  0xf5   :  { %v307_v11 = vpop.eup %306 }
  0xf6   :  { %v151_v16 = vmul.f32 %v307_v11, %v280_v13 }
  0xf7   :  { %v309_v12 = vpop.eup %308 }
  0xf8   :  { %v150_v14 = vmul.f32 %v309_v12, %v280_v13  ;;  %v155_v17 = vsel %vm59_vm0, %v151_v16, 0.0 }
  0xfa   :  { %v152_v15 = vsel %vm59_vm0, %v150_v14, 0.0 }
  0xfb   :  { %153 = vadd.xlane.f32.xlu0 %v152_v15 }
  0xff   :  { %156 = vadd.xlane.f32.xlu0 %v155_v17 }
 0x184   :  { %v154_v21 = vpop.xlane.xlu0 %153 }
 0x185   :  { %v165_v24 = vrot.slane %v154_v21, %v164_v22 }
 0x188   :  { %v157_v23 = vpop.xlane.xlu0 %156 }
 0x189   :  { %v169_v25 = vrot.slane %v157_v23, %v164_v22 }
 0x18b   :  { %v171_v26 = vsel %vm170_vm1, %v169_v25, %v165_v24 }
 0x18c   :  { %v174_v27 = vsel %vm173_vm2, %v171_v26, -inf }
 0x18d   :  { %175 = vmax.xlane.f32.xlu1 %v174_v27 }
 0x216   :  { %v176_v31 = vpop.xlane.xlu1 %175 }
 0x217   :  { %v181_v32 = vrot.slane %v176_v31, %v180_v29  ;;  %v185_v33 = vrot.slane %v176_v31, %v184_v30 }
 0x219   :  { %v188_v34 = vsub.f32 %v154_v21, %v181_v32  ;;  %v189_v35 = vsub.f32 %v157_v23, %v185_v33 }
 0x21b   :  { %v190_v36 = vmul.f32 1.442695, %v188_v34  ;;  %v192_v37 = vmul.f32 1.442695, %v189_v35 }
 0x21d   :  { %310 = vpow2.f32 %v190_v36 }
 0x21e   :  { %312 = vpow2.f32 %v192_v37 }
 0x22a   :  { %v311_v38 = vpop.eup %310 }
 0x22b   :  { %v313_v39 = vpop.eup %312  ;;  %197 = vperm.xlu1 %304, %v311_v38  }
 0x22c   :  { %200 = vperm.xlu0 %305, %v313_v39  }
 0x2a6   :  { %v198_v40 = vpop.permute.xlu1 %197 }
 0x2a7   :  { %v201_v41 = vpop.permute.xlu0 %200  ;;  %v205_v42 = vrot.slane %v198_v40, %v164_v22 }
 0x2a8   :  { %v209_v43 = vrot.slane %v201_v41, %v164_v22 }
 0x2aa   :  { %v210_v44 = vsel %vm170_vm1, %v209_v43, %v205_v42 }
 0x2ab   :  { %v212_v45 = vsel %vm173_vm2, %v210_v44, 0.0 }
 0x2ac   :  { %213 = vadd.xlane.f32.xlu1 %v212_v45 }
 0x335   :  { %v214_v46 = vpop.xlane.xlu1 %213 }
 0x336   :  { %314 = vrcp.f32 %v214_v46 }
 0x343   :  { %v315_v47 = vpop.eup %314 }
 0x344   :  { %v220_v48 = vrot.slane %v315_v47, %v180_v29  ;;  %v224_v50 = vrot.slane %v315_v47, %v184_v30 }
 0x346   :  { %v227_v49 = vmul.f32 %v311_v38, %v220_v48  ;;  %v228_v51 = vmul.f32 %v313_v39, %v224_v50 }
 0x348   :  { %231 = vperm.xlu0 %305, %v227_v49  }
 0x34c   :  { %236 = vperm.xlu0 %305, %v228_v51  }
 0x3c3   :  { %v232_v52 = vpop.permute.xlu0 %231 }
 0x3c4   :  { %v239_v53 = vmul.f32 %v232_v52, %v419_v2 }
 0x3c6   :  { %v241_v54 = vsel %vm59_vm0, %v239_v53, 0.0 }
 0x3c7   :  { %v242_v55 = vrot.slane %v241_v54, 4  ;;  %v237_v56 = vpop.permute.xlu0 %236 }
 0x3c8   :  { %v240_v57 = vmul.f32 %v237_v56, %v423_v5 }
 0x3c9   :  { %v243_v58 = vadd.f32 %v242_v55, %v241_v54 }
 0x3ca   :  { %v248_v59 = vsel %vm59_vm0, %v240_v57, 0.0 }
 0x3cb   :  { %v244_v60 = vrot.slane %v243_v58, 2  ;;  %v249_v61 = vrot.slane %v248_v59, 4 }
 0x3cd   :  { %v245_v62 = vadd.f32 %v244_v60, %v243_v58  ;;  %v250_v63 = vadd.f32 %v249_v61, %v248_v59 }
 0x3cf   :  { %v251_v0 = vrot.slane %v250_v63, 2  ;;  %v246_v1 = vrot.slane %v245_v62, 1 }
 0x3d1   :  { %v252_v3 = vadd.f32 %v251_v0, %v250_v63  ;;  %v247_v2 = vadd.f32 %v246_v1, %v245_v62 }
 0x3d3   :  { %v253_v4 = vrot.slane %v252_v3, 1 }
 0x3d5   :  { %v254_v6 = vadd.f32 %v253_v4, %v252_v3 }
 0x3d7   :  { %v257_v7 = vsel %vm170_vm1, %v254_v6, %v247_v2 }
 0x3d8   :  { %260 = vst.msk [vmem:[#allocation7] sm:$0x3] %vm259_vm3, %v257_v7 }
 0x3d9   :  { %367 = shalt.err (!%p364_p0)
}
 0x3da   :  { %270 = dma.vmem_to_hbm [thread:$0]  %s268_s3, 32, %s451_s4, [#allocation4]  }
 0x3db   :  { %380 = dma.done.wait [#allocation4], 32  }
 0x3dc   :  { %381 = vsyncadd [#allocation4], 4294967264 }
 0x3dd   :  { %274 = vsyncpa [#allocation3], 1 }
 0x3de   :  { %275 = vsyncpa [#allocation6], 1 }
 0x3df   :  { %276 = vsyncpa [#allocation4], 1 }

</bundles_post_ra>
